<compile_context>
chip_gen: v7x
topology: tpu7x:2x2x1
jax: 0.10.0
libtpu: 0.0.40
codegen_flags: <defaults>
</compile_context>

<pallas_src>
import numpy as np
import jax
import jax.numpy as jnp
from jax.experimental import pallas as pl
from jax.experimental.pallas import tpu as pltpu


def _round_up(n, m):
    return ((n + m - 1) // m) * m


def fourier_embedding_kernel(x_ref, f_ref, o_ref):
    # x_ref: (TB, 1)        f32  -- batch tile of input scalars
    # f_ref: (1, C_half)    f32  -- VMEM-resident frequency row
    # o_ref: (TB, 2*C_half) out dtype
    c_half = f_ref.shape[1]

    # outer(x, 2*pi*freqs) via broadcast: scale the (TB,1) column by 2*pi
    # (cheaper than re-scaling the freq row every step), then one VPU
    # broadcast-multiply against the resident freq row.
    phase = (x_ref[...] * jnp.float32(2.0 * np.pi)) * f_ref[...]   # (TB, C_half)

    # torch.cat([cos, sin], dim=1): two 128-aligned, lane-dense slab stores,
    # cast to the output dtype at store time.
    o_ref[:, 0:c_half] = jnp.cos(phase).astype(o_ref.dtype)
    o_ref[:, c_half:2 * c_half] = jnp.sin(phase).astype(o_ref.dtype)


def fourier_embedding_forward(x, freqs, *, block_b=512):
    """x: (B,) scalars; freqs: (C//2,) buffer. Returns (B, C) = [cos | sin]."""
    B = int(x.shape[0])
    c_half = int(freqs.shape[0])
    out_dtype = x.dtype

    x2 = x.astype(jnp.float32).reshape(B, 1)

    # Keep each output half lane-dense (multiple of 128). If C//2 is not
    # 128-aligned, pad the freq row and re-pack afterwards (extra copy).
    lane_pad = _round_up(max(c_half, 1), 128)
    f2 = freqs.astype(jnp.float32).reshape(1, c_half)
    if lane_pad != c_half:
        f2 = jnp.pad(f2, ((0, 0), (0, lane_pad - c_half)))

    # Batch tile: multiple of 8 sublanes, capped at block_b. The grid uses
    # cdiv; the partial last block (if any) is masked by Pallas, so no input
    # padding or output slicing is needed.
    tb = min(_round_up(block_b, 8), _round_up(B, 8))

    out = pl.pallas_call(
        fourier_embedding_kernel,
        out_shape=jax.ShapeDtypeStruct((B, 2 * lane_pad), out_dtype),
        grid=(pl.cdiv(B, tb),),
        in_specs=[
            pl.BlockSpec((tb, 1), lambda i: (i, 0)),           # x batch tile
            pl.BlockSpec((1, lane_pad), lambda i: (0, 0)),     # freqs, resident
        ],
        out_specs=pl.BlockSpec((tb, 2 * lane_pad), lambda i: (i, 0)),
        compiler_params=pltpu.CompilerParams(
            dimension_semantics=("parallel",)),
    )(x2, f2)

    if lane_pad != c_half:
        # Slow fallback path: drop the padded lanes of each half.
        out = jnp.concatenate(
            [out[:, :c_half], out[:, lane_pad:lane_pad + c_half]], axis=1)
    return out


def reference_forward(x, freqs):
    """Pure-JAX mirror of the torch module."""
    phase = jnp.outer(x, (2.0 * np.pi) * freqs.astype(x.dtype))
    return jnp.concatenate([jnp.cos(phase), jnp.sin(phase)], axis=1)


if __name__ == "__main__":
    # Module hyper-params: num_channels C (freqs has C//2 entries), scale=16.
    num_channels = 256          # C/2 = 128 -> lane-dense halves
    scale = 16.0
    B = 8

    key = jax.random.PRNGKey(0)
    kx, kf = jax.random.split(key)

    # Deterministic example inputs (x plays the role of per-sample noise levels).
    x = jax.random.uniform(kx, (B,), dtype=jnp.float32)
    # The module's registered buffer: randn(C//2) * scale.
    freqs = jax.random.normal(kf, (num_channels // 2,), dtype=jnp.float32) * scale

    out = fourier_embedding_forward(x, freqs)
    out = jax.block_until_ready(out)

    ref = reference_forward(x, freqs)
    assert out.shape == (B, num_channels)
    assert out.dtype == jnp.float32
    # Tolerance allows for minor divergence between Mosaic and XLA sin/cos
    # range reduction at large |phase| (scale=16 -> phases up to a few hundred).
    assert jnp.allclose(out, ref, atol=1e-3, rtol=1e-3), float(
        jnp.max(jnp.abs(out - ref)))

    print("KERNEL_OK")
</pallas_src>

<mosaic_0001>
module attributes {stable_mosaic.version = 11 : i64} {
  func.func @fourier_embedding_kernel(%arg0: i32, %arg1: memref<8x1xf32, #tpu.memory_space<vmem>>, %arg2: memref<1x128xf32, #tpu.memory_space<vmem>>, %arg3: memref<8x256xf32, #tpu.memory_space<vmem>>) attributes {dimension_semantics = [#tpu.dimension_semantics<parallel>], iteration_bounds = array<i64: 1>, scalar_prefetch = 0 : i64, scratch_operands = 0 : i64, tpu.core_type = #tpu.core_type<tc>, window_params = [{transform_indices = @transform_0, window_bounds = array<i64: 8, 1>}, {pipeline_mode = #tpu.pipeline_mode<synchronous>, transform_indices = @transform_1, window_bounds = array<i64: 1, 128>}, {transform_indices = @transform_2, window_bounds = array<i64: 8, 256>}]} {
    %c0 = arith.constant 0 : index
    %c0_0 = arith.constant 0 : index
    %0 = vector.load %arg1[%c0, %c0_0] : memref<8x1xf32, #tpu.memory_space<vmem>>, vector<8x1xf32>
    %cst = arith.constant 6.28318548 : f32
    %1 = vector.broadcast %cst : f32 to vector<8x1xf32>
    %2 = arith.mulf %0, %1 : vector<8x1xf32>
    %c0_1 = arith.constant 0 : index
    %c0_2 = arith.constant 0 : index
    %3 = vector.load %arg2[%c0_1, %c0_2] : memref<1x128xf32, #tpu.memory_space<vmem>>, vector<1x128xf32>
    %4 = vector.broadcast %2 : vector<8x1xf32> to vector<8x128xf32>
    %5 = vector.broadcast %3 : vector<1x128xf32> to vector<8x128xf32>
    %6 = arith.mulf %4, %5 : vector<8x128xf32>
    %7 = math.cos %6 : vector<8x128xf32>
    %c0_3 = arith.constant 0 : index
    %c0_4 = arith.constant 0 : index
    %8 = vector.load %arg3[%c0_3, %c0_4] : memref<8x256xf32, #tpu.memory_space<vmem>>, vector<8x128xf32>
    tpu.vector_store %arg3[%c0_3, %c0_4], %7 {strides = array<i32>} : memref<8x256xf32, #tpu.memory_space<vmem>>, vector<8x128xf32>,
    %9 = math.sin %6 : vector<8x128xf32>
    %c0_5 = arith.constant 0 : index
    %c128 = arith.constant 128 : index
    %10 = vector.load %arg3[%c0_5, %c128] : memref<8x256xf32, #tpu.memory_space<vmem>>, vector<8x128xf32>
    tpu.vector_store %arg3[%c0_5, %c128], %9 {strides = array<i32>} : memref<8x256xf32, #tpu.memory_space<vmem>>, vector<8x128xf32>,
    return
  }
  func.func @transform_0(%arg0: i32) -> (i32, i32) {
    %c0_i32 = arith.constant 0 : i32
    %c0_i32_0 = arith.constant 0 : i32
    return %arg0, %c0_i32 : i32, i32
  }
  func.func @transform_1(%arg0: i32) -> (i32, i32) {
    %c0_i32 = arith.constant 0 : i32
    %c0_i32_0 = arith.constant 0 : i32
    %c0_i32_1 = arith.constant 0 : i32
    return %c0_i32, %c0_i32_0 : i32, i32
  }
  func.func @transform_2(%arg0: i32) -> (i32, i32) {
    %c0_i32 = arith.constant 0 : i32
    %c0_i32_0 = arith.constant 0 : i32
    return %arg0, %c0_i32 : i32, i32
  }
}

</mosaic_0001>

<bundles_post_ra>
// kernel: tpu_custom_call.1
= control target key start
LH: loop header
LB: loop body
LE: loop exit
PB: predicated region body
PF: predicated region fallthrough
CT: control target
= control target key end

     0   :  { %v300_v1 = vmov 0   ;;  %s362_s0 = inlined_call_operand.vmem [shape: f32[8,1], index: 0, kind: input, shape index: {}]   ;;  %s363_s1 = inlined_call_operand.vmem [shape: f32[1,128], index: 1, kind: input, shape index: {}]   ;;  %s364_s2 = inlined_call_operand.hbm [shape: f32[8,256], index: 2, kind: output, shape index: {}]  }
   0x1   :  { %v12_v0 = vld [vmem:[%s362_s0] sm:$0xff]  ;;  %271 = vset.pattern.permute.xlu0 %v300_v1 }
   0x2   :  { %v13_v2 = vmul.f32 6.2831855, %v12_v0 }
   0x4   :  { %17 = vperm.xlu0 %271, %v13_v2  }
   0x5   :  { %7 = vsyncpa [#allocation3], 0  ;;  %v250_v3 = vld [vmem:[%s363_s1] ss:$0 sm:$0xff]  ;;  %v301_v16 = vmov 683565275  }
   0x6   :  { %v302_v18 = vmov 2475754826   ;;  %v303_v21 = vmov 2131351028   ;;  %v304_v24 = vmov 2102212464  }
   0x7   :  { %v305_v27 = vmov 920167782   ;;  %v306_v30 = vmov 1326507024   ;;  %s307_s0 = smov [#allocation2]  }
   0x8   :  { %s242_s1 = sshll.u32 %s307_s0, 4  ;;  %s243_s1 = int_to_ptr.vmem [resolvable:$true] %s242_s1 }
   0x9   :  { %s276_s13 = scalar_lea.vmem %s243_s1, 256  ;;  %p281_p1 = scmp.lt.s32.totalorder %s243_s1, %s243_s1 }
   0xa   :  { %p277_p0 = scmp.ne.s32.totalorder %s243_s1, %s276_s13  ;;  %p282_p2 = scmp.lt.s32.totalorder %s276_s13, %s276_s13 }
   0xc   :  { %p283_p3 = por %p282_p2, %p281_p1 }
   0xe   :  { %p284_p4 = pnand %p283_p3, %p277_p0 }
  0x83   :  { %v18_v4 = vpop.permute.xlu0 %17 }
  0x84   :  { %v329_v5 = vmul.f32 %v250_v3, %v18_v4 }
  0x86   :  { %v30_v6 = vand.u32 2139095040, %v329_v5  ;;  %v27_v10 = vand.u32 2147483647, %v329_v5  ;;  %vm29_vm7 = vcmp.lt.s32.totalorder %v329_v5, 0  ;;  %vm119_vm15 = vweird.f32 %v329_v5 }
  0x88   :  { %v31_v7 = vshrl.u32 %v30_v6, 23  ;;  %v34_v13 = vand.u32 8388607, %v27_v10  ;;  %vm28_vm8 = vcmp.le.f32.partialorder %v27_v10, 0.7853982 }
  0x8a   :  { %v251_v8 = vadd.s32 4294967169, %v31_v7  ;;  %v35_v32 = vor.u32 8388608, %v34_v13 }
  0x8c   :  { %v37_v9 = vadd.s32 1, %v251_v8  ;;  %v75_v46 = vshll.u32 %v35_v32, 8 }
  0x8e   :  { %vm38_vm0 = vcmp.gt.s32.totalorder %v37_v9, 0 }
  0x8f   :  { %v39_v11 = vsel %vm38_vm0, %v37_v9, 0 }
  0x90   :  { %v41_v12 = vand.u32 31, %v39_v11  ;;  %v40_v15 = vshrl.u32 %v39_v11, 5 }
  0x92   :  { %v42_v14 = vsub.s32 32, %v41_v12  ;;  %v44_v17 = vshll.u32 %v301_v16, %v41_v12  ;;  %v47_v19 = vshll.u32 %v302_v18, %v41_v12  ;;  %v50_v23 = vshll.u32 %v303_v21, %v41_v12 }
  0x93   :  { %v53_v26 = vshll.u32 %v304_v24, %v41_v12  ;;  %v56_v29 = vshll.u32 %v305_v27, %v41_v12  ;;  %vm59_vm1 = vcmp.lt.s32.totalorder %v40_v15, 1  ;;  %vm62_vm2 = vcmp.lt.s32.totalorder %v40_v15, 4 }
  0x94   :  { %v45_v20 = vshrl.u32 %v302_v18, %v42_v14  ;;  %v48_v22 = vshrl.u32 %v303_v21, %v42_v14  ;;  %v51_v25 = vshrl.u32 %v304_v24, %v42_v14  ;;  %v54_v28 = vshrl.u32 %v305_v27, %v42_v14 }
  0x95   :  { %v57_v31 = vshrl.u32 %v306_v30, %v42_v14  ;;  %v43_v41 = vshrl.u32 %v301_v16, %v42_v14  ;;  %vm61_vm3 = vcmp.lt.s32.totalorder %v40_v15, 3  ;;  %vm60_vm4 = vcmp.lt.s32.totalorder %v40_v15, 2 }
  0x96   :  { %v46_v33 = vor.u32 %v45_v20, %v44_v17  ;;  %v49_v34 = vor.u32 %v48_v22, %v47_v19  ;;  %v52_v35 = vor.u32 %v51_v25, %v50_v23  ;;  %v55_v36 = vor.u32 %v54_v28, %v53_v26 }
  0x97   :  { %v58_v37 = vor.u32 %v57_v31, %v56_v29 }
  0x98   :  { %v64_v38 = vsel %vm62_vm2, %v52_v35, 2102212464  ;;  %v67_v39 = vsel %vm59_vm1, %v46_v33, %v49_v34  ;;  %v71_v40 = vsel %vm59_vm1, %v49_v34, %v52_v35  ;;  %v68_v42 = vsel %vm62_vm2, %v55_v36, 920167782 }
  0x99   :  { %v72_v43 = vsel %vm62_vm2, %v58_v37, 1326507024  ;;  %v69_v44 = vsel %vm61_vm3, %v52_v35, %v68_v42  ;;  %v63_v47 = vsel %vm59_vm1, %v43_v41, %v46_v33  ;;  %v65_v48 = vsel %vm61_vm3, %v49_v34, %v64_v38 }
  0x9a   :  { %v73_v45 = vsel %vm61_vm3, %v55_v36, %v72_v43  ;;  %v70_v49 = vsel %vm60_vm4, %v67_v39, %v69_v44  ;;  %v66_v55 = vsel %vm60_vm4, %v63_v47, %v65_v48 }
  0x9b   :  { %v74_v50 = vsel %vm60_vm4, %v71_v40, %v73_v45  ;;  %v338_v53 = vmul.u32.u64.low %v75_v46, %v70_v49  ;;  %v339_v54 = vmul.u32.u64.high %v75_v46, %v70_v49, %v338_v53  ;;  %v82_v57 = vmul.u32 %v75_v46, %v66_v55 }
  0x9c   :  { %v335_v51 = vmul.u32.u64.low %v75_v46, %v74_v50  ;;  %v336_v52 = vmul.u32.u64.high %v75_v46, %v74_v50, %v335_v51 }
  0x9d   :  { %v85_v56 = vadd.s32 1, %v339_v54 }
  0x9e   :  { %vm84_vm5 = vc.u32 %v336_v52, %v338_v53  ;;  %v83_v6 = vadd.s32 %v338_v53, %v336_v52 }
  0x9f   :  { %v86_v58 = vsel %vm84_vm5, %v85_v56, %v339_v54 }
  0xa0   :  { %v87_v59 = vadd.s32 %v86_v58, %v82_v57 }
  0xa2   :  { %v88_v60 = vadd.s32 536870912, %v87_v59 }
  0xa4   :  { %v89_v61 = vshrl.u32 %v88_v60, 30 }
  0xa6   :  { %v90_v62 = vshll.u32 %v89_v61, 30  ;;  %v113_v19 = vsub.s32 4, %v89_v61 }
  0xa8   :  { %v91_v63 = vsub.s32 %v87_v59, %v90_v62  ;;  %v114_v22 = vsel %vm29_vm7, %v113_v19, %v89_v61 }
  0xa9   :  { %v116_v24 = vsel %vm28_vm8, 0, %v114_v22 }
  0xaa   :  { %v93_v0 = vsub.s32 0, %v91_v63  ;;  %v224_v25 = vadd.s32 3, %v116_v24  ;;  %v120_v26 = vand.u32 3, %v116_v24 }
  0xac   :  { %v252_v1 = vmin.u32 %v93_v0, %v91_v63  ;;  %v225_v27 = vand.u32 3, %v224_v25  ;;  %vm125_vm9 = vcmp.eq.s32.totalorder %v120_v26, 2  ;;  %vm122_vm11 = vcmp.eq.s32.totalorder %v120_v26, 0 }
  0xad   :  { %vm121_vm13 = vcmp.lt.s32.totalorder %v120_v26, 2 }
  0xae   :  { %v95_v2 = vclz %v252_v1  ;;  %vm230_vm10 = vcmp.eq.s32.totalorder %v225_v27, 2  ;;  %vm227_vm12 = vcmp.eq.s32.totalorder %v225_v27, 0  ;;  %vm226_vm14 = vcmp.lt.s32.totalorder %v225_v27, 2 }
  0xb0   :  { %v253_v3 = vadd.s32 4294967294, %v95_v2 }
  0xb2   :  { %vm254_vm6 = vcmp.lt.s32.totalorder %v253_v3, 0 }
  0xb3   :  { %v98_v4 = vsel %vm254_vm6, 0, %v253_v3 }
  0xb4   :  { %v99_v7 = vsub.s32 32, %v98_v4  ;;  %v103_v8 = vsub.s32 4294967266, %v98_v4  ;;  %v100_v9 = vshll.u32 %v91_v63, %v98_v4 }
  0xb6   :  { %v101_v11 = vshrl.u32 %v83_v6, %v99_v7  ;;  %v104_v12 = vadd.s32 127, %v103_v8 }
  0xb8   :  { %v102_v13 = vor.u32 %v101_v11, %v100_v9  ;;  %v105_v14 = vshll.u32 %v104_v12, 23 }
  0xba   :  { %v106_v15 = vor.u32 4788187, %v105_v14  ;;  %v109_v17 = vcvt.s32.f32 %v102_v13 }
  0xbc   :  { %v107_v16 = vand.u32 2147483647, %v106_v15 }
  0xbe   :  { %v110_v18 = vmul.f32 %v109_v17, %v107_v16 }
  0xc0   :  { %v111_v20 = vxor.u32 2147483648, %v110_v18 }
  0xc2   :  { %v112_v21 = vsel %vm29_vm7, %v111_v20, %v110_v18 }
  0xc3   :  { %v115_v23 = vsel %vm28_vm8, %v329_v5, %v112_v21 }
  0xc4   :  { %272 = vcosq.f32 %v115_v23 }
  0xc5   :  { %274 = vsinq.f32 %v115_v23 }
  0xce   :  { %v273_v28 = vpop.eup %272 }
  0xcf   :  { %v275_v29 = vpop.eup %274  ;;  %v126_v30 = vxor.u32 2147483648, %v273_v28 }
  0xd0   :  { %v123_v31 = vxor.u32 2147483648, %v275_v29 }
  0xd1   :  { %v127_v10 = vsel %vm125_vm9, %v126_v30, %v275_v29  ;;  %v232_v32 = vsel %vm230_vm10, %v126_v30, %v275_v29 }
  0xd2   :  { %v124_v33 = vsel %vm122_vm11, %v273_v28, %v123_v31  ;;  %v229_v34 = vsel %vm227_vm12, %v273_v28, %v123_v31 }
  0xd3   :  { %v128_v35 = vsel %vm121_vm13, %v124_v33, %v127_v10  ;;  %v233_v36 = vsel %vm226_vm14, %v229_v34, %v232_v32 }
  0xd4   :  { %v129_v37 = vsel %vm119_vm15, nan, %v128_v35  ;;  %v234_v38 = vsel %vm119_vm15, nan, %v233_v36 }
  0xd5   :  { %130 = vst [vmem:[#allocation2] sm:$0xff] %v129_v37  ;;  %235 = vst [vmem:[#allocation2 + $0x8] sm:$0xff] %v234_v38 }
  0xd6   :  { %287 = shalt.err (!%p284_p4)
}
  0xd7   :  { %s288_s16 = scalar_lea.hbm %s364_s2, 256 }
  0xd8   :  { %p289_p5 = scmp.ne.s32.totalorder %s364_s2, %s288_s16  ;;  %p292_p6 = scmp.lt.u32.totalorder %s288_s16, %s364_s2 }
  0xda   :  { %p294_p7 = pnand %p292_p6, %p289_p5 }
  0xdc   :  { %297 = shalt.err (!%p294_p7)
}
  0xdd   :  { %245 = dma.vmem_to_hbm [thread:$0]  %s243_s1, 256, %s364_s2, [#allocation3]  }
  0xde   :  { %298 = dma.done.wait [#allocation3], 256  }
  0xdf   :  { %299 = vsyncadd [#allocation3], 4294967040 }
  0xe0   :  { %249 = vsyncpa [#allocation3], 1 }

</bundles_post_ra>
